<compile_context>
chip_gen: v6e
topology: v6e:2x2x1
jax: 0.10.0
libtpu: 0.0.40
codegen_flags: <defaults>
</compile_context>

<pallas_src>
import jax
import jax.numpy as jnp
import numpy as np
from jax.experimental import pallas as pl
from jax.experimental.pallas import tpu as pltpu


# ----------------------------- Pallas kernel --------------------------------
def text_gnn_kernel(p_ref,      # (1, GN, GN)  bf16  block-diag propagation matrix (G graphs)
                    proot_ref,  # (1, G,  GN)  bf16  root row of P for each graph
                    x_ref,      # (1, GN, Din) bf16  fused word embeddings
                    w1_ref,     # (Din, Dh)    bf16
                    b1_ref,     # (1, Dh)      f32
                    w2_ref,     # (Dh, Do)     bf16
                    b2_ref,     # (1, Do)      f32
                    out_ref):   # (1, G, Do)   f32   root-node GNN output per graph
    P = p_ref[0]
    Pr = proot_ref[0]
    X = x_ref[0]

    # GCNConv #1 over all G graphs at once:  H1 = relu(P @ (X @ W1) + b1)
    xw = jnp.dot(X, w1_ref[...], preferred_element_type=jnp.float32)           # (GN, Dh) f32
    h1 = jnp.dot(P, xw.astype(jnp.bfloat16),
                 preferred_element_type=jnp.float32) + b1_ref[...]             # (GN, Dh) f32
    h1 = jnp.maximum(h1, 0.0)                                                  # ReLU in f32 (VPU)
    # F.dropout(..., training=False) -> identity (eval mode)

    # GCNConv #2, root rows only:  out_g = (P[root_g] @ H1) @ W2 + b2
    r = jnp.dot(Pr, h1.astype(jnp.bfloat16),
                preferred_element_type=jnp.float32)                            # (G, Dh) f32
    out = jnp.dot(r.astype(jnp.bfloat16), w2_ref[...],
                  preferred_element_type=jnp.float32) + b2_ref[...]            # (G, Do) f32
    # nn.Dropout(0.1) -> identity (eval mode)
    out_ref[...] = out.reshape(out_ref.shape).astype(out_ref.dtype)


def text_gnn_forward(P_blk, P_roots, Xp, W1, b1, W2, b2):
    """P_blk: (nb, GN, GN), P_roots: (nb, G, GN), Xp: (nb, GN, Din) -> (nb*G, Do) f32."""
    nb, GN, _ = P_blk.shape
    G = P_roots.shape[1]
    Din = Xp.shape[2]
    Dh = W1.shape[1]
    Do = W2.shape[1]

    # bf16 operands (halves DMA bytes, doubles MXU rate); biases / accum stay f32.
    P_blk_b = P_blk.astype(jnp.bfloat16)
    P_roots_b = P_roots.astype(jnp.bfloat16)
    Xp_b = Xp.astype(jnp.bfloat16)
    W1_b = W1.astype(jnp.bfloat16)
    W2_b = W2.astype(jnp.bfloat16)
    b1_f = b1.astype(jnp.float32)
    b2_f = b2.astype(jnp.float32)

    flops = 2 * nb * (GN * Din * Dh      # X @ W1
                      + GN * GN * Dh     # P_blk @ (X W1)
                      + G * GN * Dh      # P_root @ H1
                      + G * Dh * Do)     # root rows @ W2
    bytes_accessed = (2 * (nb * GN * GN + nb * G * GN + nb * GN * Din
                           + Din * Dh + Dh * Do)
                      + 4 * (Dh + Do + nb * G * Do))
    cost = pl.CostEstimate(flops=flops, transcendentals=0,
                           bytes_accessed=bytes_accessed)

    out = pl.pallas_call(
        text_gnn_kernel,
        out_shape=jax.ShapeDtypeStruct((nb, G, Do), jnp.float32),
        grid_spec=pltpu.PrefetchScalarGridSpec(
            num_scalar_prefetch=0,
            grid=(nb,),
            in_specs=[
                pl.BlockSpec((1, GN, GN), lambda i: (i, 0, 0)),
                pl.BlockSpec((1, G, GN), lambda i: (i, 0, 0)),
                pl.BlockSpec((1, GN, Din), lambda i: (i, 0, 0)),
                pl.BlockSpec((Din, Dh), lambda i: (0, 0)),
                pl.BlockSpec((1, Dh), lambda i: (0, 0)),
                pl.BlockSpec((Dh, Do), lambda i: (0, 0)),
                pl.BlockSpec((1, Do), lambda i: (0, 0)),
            ],
            out_specs=pl.BlockSpec((1, G, Do), lambda i: (i, 0, 0)),
        ),
        compiler_params=pltpu.CompilerParams(
            dimension_semantics=("parallel",)),
        cost_estimate=cost,
    )(P_blk_b, P_roots_b, Xp_b, W1_b, b1_f, W2_b, b2_f)
    return out.reshape(nb * G, Do)


# ------------------------------ host-side glue --------------------------------
def build_prop_matrix(arcs, num_tokens):
    """Reproduce: adj[head-1, i] = 1, dense_to_sparse, GCN normalization.

    PyG GCNConv (source->target flow) computes out_i = sum_j A'[j,i] dj^-1/2 di^-1/2 x_j
    with A' = A + I.  Returned P satisfies out = P @ x.
    """
    A = np.zeros((num_tokens, num_tokens), dtype=np.float32)
    for i, head in enumerate(arcs):
        A[head - 1, i] = 1.0
    A_hat = A + np.eye(num_tokens, dtype=np.float32)
    deg_in = A_hat.sum(axis=0)
    dinv = 1.0 / np.sqrt(np.maximum(deg_in, 1e-12))
    S = dinv[:, None] * A_hat * dinv[None, :]
    return S.T.astype(np.float32)


def pack_graph_blocks(P_all, roots, G):
    """Pack G graphs per block: block-diagonal P and per-graph root rows of P."""
    B, N, _ = P_all.shape
    assert B % G == 0
    nb = B // G
    GN = G * N
    P_blk = np.zeros((nb, GN, GN), dtype=np.float32)
    P_roots = np.zeros((nb, G, GN), dtype=np.float32)
    for blk in range(nb):
        for g in range(G):
            b = blk * G + g
            sl = slice(g * N, (g + 1) * N)
            P_blk[blk, sl, sl] = P_all[b]
            P_roots[blk, g, sl] = P_all[b, roots[b]]
    return P_blk, P_roots


if __name__ == "__main__":
    # Small synthetic shapes (module uses 768-dim; scaled down, lane-aligned).
    B, N = 16, 16          # B texts/graphs, N words (nodes) per graph
    G = 8                  # graphs fused per grid step -> fused rows G*N = 128, grid=(2,)
    Din = Dh = Do = 128    # textGNN(768, 768, 768) scaled to 128

    key = jax.random.PRNGKey(0)
    kx, kw1, kb1, kw2, kb2, karc, kroot = jax.random.split(key, 7)

    # Synthetic "BERT word embeddings" (stand-in for the last_hidden_state gather).
    X = jax.random.normal(kx, (B, N, Din), dtype=jnp.float32)

    # Deterministic GCN parameters.
    W1 = jax.random.normal(kw1, (Din, Dh), dtype=jnp.float32) * 0.05
    b1 = jax.random.normal(kb1, (1, Dh), dtype=jnp.float32) * 0.01
    W2 = jax.random.normal(kw2, (Dh, Do), dtype=jnp.float32) * 0.05
    b2 = jax.random.normal(kb2, (1, Do), dtype=jnp.float32) * 0.01

    # Synthetic dependency arcs (heads in 1..N) and root word ids (from parser in original).
    arcs_np = np.asarray(jax.random.randint(karc, (B, N), 1, N + 1))
    roots_np = np.asarray(jax.random.randint(kroot, (B,), 0, N))

    P_all = np.stack([build_prop_matrix(list(arcs_np[b]), N) for b in range(B)])
    P_blk_np, P_roots_np = pack_graph_blocks(P_all, roots_np, G)

    Xp = X.reshape(B // G, G * N, Din)           # fuse G graphs' node rows per block
    P_blk = jnp.asarray(P_blk_np)
    P_roots = jnp.asarray(P_roots_np)

    out = text_gnn_forward(P_blk, P_roots, Xp, W1, b1, W2, b2)
    out = jax.block_until_ready(out)
    assert out.shape == (B, Do)

    # Pure-JAX reference mirroring the same bf16-operand / f32-accumulate math
    # (GCN -> ReLU -> GCN root-row -> gather), built from the UNPACKED per-graph data.
    Pb = jnp.asarray(P_all).astype(jnp.bfloat16)
    Xb = X.astype(jnp.bfloat16)
    W1b = W1.astype(jnp.bfloat16)
    W2b = W2.astype(jnp.bfloat16)
    xw = jnp.einsum('bnd,dh->bnh', Xb, W1b, preferred_element_type=jnp.float32)
    h1 = jnp.einsum('bnm,bmh->bnh', Pb, xw.astype(jnp.bfloat16),
                    preferred_element_type=jnp.float32) + b1
    h1 = jnp.maximum(h1, 0.0)
    pr = Pb[jnp.arange(B), roots_np]                                 # root rows of P
    r = jnp.einsum('bn,bnh->bh', pr, h1.astype(jnp.bfloat16),
                   preferred_element_type=jnp.float32)
    ref = jnp.einsum('bh,ho->bo', r.astype(jnp.bfloat16), W2b,
                     preferred_element_type=jnp.float32) + b2

    np.testing.assert_allclose(np.asarray(out), np.asarray(ref), rtol=2e-3, atol=2e-3)

    print("KERNEL_OK")
</pallas_src>

<mosaic_0001>
module attributes {stable_mosaic.version = 11 : i64} {
  func.func @text_gnn_kernel(%arg0: i32, %arg1: memref<1x128x128xbf16, #tpu.memory_space<vmem>>, %arg2: memref<1x8x128xbf16, #tpu.memory_space<vmem>>, %arg3: memref<1x128x128xbf16, #tpu.memory_space<vmem>>, %arg4: memref<128x128xbf16, #tpu.memory_space<vmem>>, %arg5: memref<1x128xf32, #tpu.memory_space<vmem>>, %arg6: memref<128x128xbf16, #tpu.memory_space<vmem>>, %arg7: memref<1x128xf32, #tpu.memory_space<vmem>>, %arg8: memref<1x8x128xf32, #tpu.memory_space<vmem>>) attributes {dimension_semantics = [#tpu.dimension_semantics<parallel>], iteration_bounds = array<i64: 2>, scalar_prefetch = 0 : i64, scratch_operands = 0 : i64, tpu.core_type = #tpu.core_type<tc>, window_params = [{transform_indices = @transform_0, window_bounds = array<i64: 1, 128, 128>}, {transform_indices = @transform_1, window_bounds = array<i64: 1, 8, 128>}, {transform_indices = @transform_2, window_bounds = array<i64: 1, 128, 128>}, {pipeline_mode = #tpu.pipeline_mode<synchronous>, transform_indices = @transform_3, window_bounds = array<i64: 128, 128>}, {pipeline_mode = #tpu.pipeline_mode<synchronous>, transform_indices = @transform_4, window_bounds = array<i64: 1, 128>}, {pipeline_mode = #tpu.pipeline_mode<synchronous>, transform_indices = @transform_5, window_bounds = array<i64: 128, 128>}, {pipeline_mode = #tpu.pipeline_mode<synchronous>, transform_indices = @transform_6, window_bounds = array<i64: 1, 128>}, {transform_indices = @transform_7, window_bounds = array<i64: 1, 8, 128>}]} {
    %c0 = arith.constant 0 : index
    %c0_0 = arith.constant 0 : index
    %c0_1 = arith.constant 0 : index
    %0 = vector.load %arg1[%c0, %c0_0, %c0_1] : memref<1x128x128xbf16, #tpu.memory_space<vmem>>, vector<1x128x128xbf16>
    %1 = vector.shape_cast %0 : vector<1x128x128xbf16> to vector<128x128xbf16>
    %c0_2 = arith.constant 0 : index
    %c0_3 = arith.constant 0 : index
    %c0_4 = arith.constant 0 : index
    %2 = vector.load %arg2[%c0_2, %c0_3, %c0_4] : memref<1x8x128xbf16, #tpu.memory_space<vmem>>, vector<1x8x128xbf16>
    %3 = vector.shape_cast %2 : vector<1x8x128xbf16> to vector<8x128xbf16>
    %c0_5 = arith.constant 0 : index
    %c0_6 = arith.constant 0 : index
    %c0_7 = arith.constant 0 : index
    %4 = vector.load %arg3[%c0_5, %c0_6, %c0_7] : memref<1x128x128xbf16, #tpu.memory_space<vmem>>, vector<1x128x128xbf16>
    %5 = vector.shape_cast %4 : vector<1x128x128xbf16> to vector<128x128xbf16>
    %c0_8 = arith.constant 0 : index
    %c0_9 = arith.constant 0 : index
    %6 = vector.load %arg4[%c0_8, %c0_9] : memref<128x128xbf16, #tpu.memory_space<vmem>>, vector<128x128xbf16>
    %cst = arith.constant dense<0.000000e+00> : vector<128x128xf32>
    %7 = tpu.matmul %5, %6, %cst {dimension_numbers = #tpu.dot_dimension_numbers<[1], [0], [0], [1], [0, 0, 1, 1], [], []>} : vector<128x128xbf16>, vector<128x128xbf16>, vector<128x128xf32> -> vector<128x128xf32>
    %8 = arith.truncf %7 : vector<128x128xf32> to vector<128x128xbf16>
    %cst_10 = arith.constant dense<0.000000e+00> : vector<128x128xf32>
    %9 = tpu.matmul %1, %8, %cst_10 {dimension_numbers = #tpu.dot_dimension_numbers<[1], [0], [0], [1], [0, 0, 1, 1], [], []>} : vector<128x128xbf16>, vector<128x128xbf16>, vector<128x128xf32> -> vector<128x128xf32>
    %c0_11 = arith.constant 0 : index
    %c0_12 = arith.constant 0 : index
    %10 = vector.load %arg5[%c0_11, %c0_12] : memref<1x128xf32, #tpu.memory_space<vmem>>, vector<1x128xf32>
    %11 = vector.broadcast %10 : vector<1x128xf32> to vector<128x128xf32>
    %12 = arith.addf %9, %11 : vector<128x128xf32>
    %cst_13 = arith.constant 0.000000e+00 : f32
    %13 = vector.broadcast %cst_13 : f32 to vector<128x128xf32>
    %14 = arith.maximumf %12, %13 : vector<128x128xf32>
    %15 = arith.truncf %14 : vector<128x128xf32> to vector<128x128xbf16>
    %cst_14 = arith.constant dense<0.000000e+00> : vector<8x128xf32>
    %16 = tpu.matmul %3, %15, %cst_14 {dimension_numbers = #tpu.dot_dimension_numbers<[1], [0], [0], [1], [0, 0, 1, 1], [], []>} : vector<8x128xbf16>, vector<128x128xbf16>, vector<8x128xf32> -> vector<8x128xf32>
    %17 = arith.truncf %16 : vector<8x128xf32> to vector<8x128xbf16>
    %c0_15 = arith.constant 0 : index
    %c0_16 = arith.constant 0 : index
    %18 = vector.load %arg6[%c0_15, %c0_16] : memref<128x128xbf16, #tpu.memory_space<vmem>>, vector<128x128xbf16>
    %cst_17 = arith.constant dense<0.000000e+00> : vector<8x128xf32>
    %19 = tpu.matmul %17, %18, %cst_17 {dimension_numbers = #tpu.dot_dimension_numbers<[1], [0], [0], [1], [0, 0, 1, 1], [], []>} : vector<8x128xbf16>, vector<128x128xbf16>, vector<8x128xf32> -> vector<8x128xf32>
    %c0_18 = arith.constant 0 : index
    %c0_19 = arith.constant 0 : index
    %20 = vector.load %arg7[%c0_18, %c0_19] : memref<1x128xf32, #tpu.memory_space<vmem>>, vector<1x128xf32>
    %21 = vector.broadcast %20 : vector<1x128xf32> to vector<8x128xf32>
    %22 = arith.addf %19, %21 : vector<8x128xf32>
    %23 = vector.shape_cast %22 : vector<8x128xf32> to vector<1x8x128xf32>
    %c0_20 = arith.constant 0 : index
    %c0_21 = arith.constant 0 : index
    %c0_22 = arith.constant 0 : index
    %24 = vector.load %arg8[%c0_20, %c0_21, %c0_22] : memref<1x8x128xf32, #tpu.memory_space<vmem>>, vector<1x8x128xf32>
    tpu.vector_store %arg8[%c0_20, %c0_21, %c0_22], %23 {strides = array<i32>} : memref<1x8x128xf32, #tpu.memory_space<vmem>>, vector<1x8x128xf32>,
    return
  }
  func.func @transform_0(%arg0: i32) -> (i32, i32, i32) {
    %c0_i32 = arith.constant 0 : i32
    %c0_i32_0 = arith.constant 0 : i32
    %c0_i32_1 = arith.constant 0 : i32
    return %arg0, %c0_i32, %c0_i32_0 : i32, i32, i32
  }
  func.func @transform_1(%arg0: i32) -> (i32, i32, i32) {
    %c0_i32 = arith.constant 0 : i32
    %c0_i32_0 = arith.constant 0 : i32
    %c0_i32_1 = arith.constant 0 : i32
    return %arg0, %c0_i32, %c0_i32_0 : i32, i32, i32
  }
  func.func @transform_2(%arg0: i32) -> (i32, i32, i32) {
    %c0_i32 = arith.constant 0 : i32
    %c0_i32_0 = arith.constant 0 : i32
    %c0_i32_1 = arith.constant 0 : i32
    return %arg0, %c0_i32, %c0_i32_0 : i32, i32, i32
  }
  func.func @transform_3(%arg0: i32) -> (i32, i32) {
    %c0_i32 = arith.constant 0 : i32
    %c0_i32_0 = arith.constant 0 : i32
    %c0_i32_1 = arith.constant 0 : i32
    return %c0_i32, %c0_i32_0 : i32, i32
  }
  func.func @transform_4(%arg0: i32) -> (i32, i32) {
    %c0_i32 = arith.constant 0 : i32
    %c0_i32_0 = arith.constant 0 : i32
    %c0_i32_1 = arith.constant 0 : i32
    return %c0_i32, %c0_i32_0 : i32, i32
  }
  func.func @transform_5(%arg0: i32) -> (i32, i32) {
    %c0_i32 = arith.constant 0 : i32
    %c0_i32_0 = arith.constant 0 : i32
    %c0_i32_1 = arith.constant 0 : i32
    return %c0_i32, %c0_i32_0 : i32, i32
  }
  func.func @transform_6(%arg0: i32) -> (i32, i32) {
    %c0_i32 = arith.constant 0 : i32
    %c0_i32_0 = arith.constant 0 : i32
    %c0_i32_1 = arith.constant 0 : i32
    return %c0_i32, %c0_i32_0 : i32, i32
  }
  func.func @transform_7(%arg0: i32) -> (i32, i32, i32) {
    %c0_i32 = arith.constant 0 : i32
    %c0_i32_0 = arith.constant 0 : i32
    %c0_i32_1 = arith.constant 0 : i32
    return %arg0, %c0_i32, %c0_i32_0 : i32, i32, i32
  }
}

</mosaic_0001>

<bundles_post_ra>
// kernel: tpu_custom_call.1
= control target key start
LH: loop header
LB: loop body
LE: loop exit
PB: predicated region body
PF: predicated region fallthrough
CT: control target
= control target key end

     0   :  { %s2025_s0 = inlined_call_operand.hbm [shape: bf16[2,128,128], index: 0, kind: input, shape index: {}]   ;;  %s2026_s1 = inlined_call_operand.hbm [shape: bf16[2,8,128], index: 1, kind: input, shape index: {}]   ;;  %s2027_s2 = inlined_call_operand.hbm [shape: bf16[2,128,128], index: 2, kind: input, shape index: {}]   ;;  %s2028_s3 = inlined_call_operand.hbm [shape: bf16[128,128], index: 3, kind: input, shape index: {}]   ;;  %s2029_s4 = inlined_call_operand.vmem [shape: f32[1,128], index: 4, kind: input, shape index: {}]   ;;  %s2030_s5 = inlined_call_operand.hbm [shape: bf16[128,128], index: 5, kind: input, shape index: {}]   ;;  %s2031_s6 = inlined_call_operand.vmem [shape: f32[1,128], index: 6, kind: input, shape index: {}]   ;;  %s2032_s7 = inlined_call_operand.hbm [shape: f32[2,8,128], index: 7, kind: output, shape index: {}]  }
   0x1   :  { %2048 = sst [smem:[#allocation20_spill]] %s2026_s1 }
   0x2   :  { %2049 = sst [smem:[#allocation21_spill]] %s2028_s3 }
   0x3   :  { %2050 = sst [smem:[#allocation22_spill]] %s2030_s5 }
   0x4   :  { %12 = vsyncpa [#allocation3], 0 }
   0x5   :  { %14 = vsyncpa [#allocation3 + $0x1], 0 }
   0x6   :  { %15 = vsyncpa [#allocation6], 0 }
   0x7   :  { %17 = vsyncpa [#allocation6 + $0x1], 0 }
   0x8   :  { %18 = vsyncpa [#allocation9], 0 }
   0x9   :  { %19 = vsyncpa [#allocation4], 0 }
   0xa   :  { %21 = vsyncpa [#allocation4 + $0x1], 0  ;;  %s1713_s24 = smov 0   ;;  %s1715_s25 = smov 0  }
   0xb   :  { %s1717_s26 = smov 0   ;;  %s1719_s27 = smov 0  }
   0xc LB: > { %2051 = sst [smem:[#allocation16_spill]] %s1657_s26  ;;  %s1734_s28 = sadd.s32 4294967295, %s1661_s27   ;;  %s1661_s27 = sphi %s1719_s27, %s2079_s27   ;;  %s1657_s26 = sphi %s1717_s26, %s2084_s26   ;;  %s1653_s25 = sphi %s1715_s25, %s2083_s25   ;;  %s1649_s24 = sphi %s1713_s24, %s2082_s24  }
   0xd   : > { %s1126_s29 = sadd.s32 4294967294, %s1661_s27   ;;  %p47_p0 = scmp.ne.s32.totalorder %s1653_s25, %s1649_s24 }
   0xe   : > { %p2038_p1 = scmp.eq.s32.totalorder %s1734_s28, 0  ;;  %p207_p2 = scmp.eq.s32.totalorder %s1734_s28, 1 }
   0xf   : > { %p213_p3 = scmp.eq.s32.totalorder %s1126_s29, 1  ;;  %p1127_p5 = scmp.ge.s32.totalorder %s1661_s27, 1 }
  0x10   : > { %p1743_p4 = por %p2038_p1, %p47_p0  ;;  %p220_p7 = scmp.lt.s32.totalorder %s1661_s27, 3 }
  0x11   : > { %p1748_p6 = por %p213_p3, %p47_p0  ;;  %s1663_s10 = smov [#allocation8]  }
  0x12   : > { %s2052_s30 = scalar_select %p1743_p4, 1, 0 }
  0x13   : > { %s2053_s8 = scalar_select %p1748_p6, 1, 0 }
  0x14   : > { %p1753_p8 = pnand %p1127_p5, %p220_p7  ;;  %s232_s11 = sshll.u32 %s1663_s10, 4  ;;  %s233_s11 = int_to_ptr.vmem [resolvable:$true] %s232_s11 }
  0x15   : > { %2054 = sst [smem:[#allocation17_spill]] %s2053_s8  ;;  %s1767_s13 = sadd.s32 1, %s1661_s27  }
  0x16   : > { %s2055_s9 = scalar_select %p1753_p8, 1, 0 }
  0x17   : > { %p1356_p9 = pneg %p1753_p8  ;;  %2057 = sst [smem:[#allocation18_spill]] %s1767_s13 }
  0x18   : > { %s34_s14 = sadd.s32 1, %s1657_s26  ;;  %s31_s15 = ssub.s32 %s1661_s27, %s1767_s13 }
  0x19   : > { %p1762_p11 = pnand %p1356_p9, %p2038_p1  ;;  %s1464_s16 = scalar_lea.vmem %s233_s11, 1024 }
  0x1a   : > { %p1465_p13 = scmp.ne.s32.totalorder %s233_s11, %s1464_s16  ;;  %p1472_p5 = scmp.lt.s32.totalorder %s233_s11, %s233_s11 }
  0x1b   : > { %s2056_s12 = scalar_select %p1762_p11, 1, 0 }
  0x1c   : > { %p2039_p12 = pneg %p1762_p11  ;;  %p1473_p7 = scmp.lt.s32.totalorder %s1464_s16, %s1464_s16 }
  0x1e   : > { %p1467_p0 = pnand %p1465_p13, %p2039_p12  ;;  %p1474_p9 = por %p1473_p7, %p1472_p5 }
  0x20   : > { %p1468_p3 = pneg %p1467_p0 }
  0x22   : > { %p1475_p10 = pnand %p1474_p9, %p1468_p3 }
  0x24   : > { %1478 = shalt.err (!%p1475_p10)
}
  0x25   : > { %s2033_s17 = smov 64   ;;  %s2035_s18 = smov 4  }
  0x26   : > { %s2058_s3 = sld [smem:[#allocation21_spill]]  ;;  %p32_p10 = scmp.eq.s32.totalorder %s31_s15, 0 }
  0x27   : > { %p41_p13 = scmp.ne.s32.totalorder %s1657_s26, %s1653_s25  ;;  %p42_p0 = scmp.eq.s32.totalorder %s1661_s27, 0 }
  0x28   : > { %p1379_p3 = scmp.lt.s32.totalorder %s1661_s27, 2  ;;  %s1799_s23 = sand.u32 1, %s1657_s26  }
  0x29   : > { %s1790_s21 = scalar_select %p32_p10, %s1657_s26, %s34_s14  }
  0x2a   : > { %p43_p5 = por %p42_p0, %p41_p13  ;;  %p1794_p7 = por %p207_p2, %p41_p13 }
  0x2b   : > { %2059 = sst [smem:[#allocation19_spill]] %s1790_s21  ;;  %s286_s29 = sand.u32 1, %s1661_s27  }
  0x2c   : > { %1359 = dma.hbm_to_vmem [thread:$0]  (!%p1762_p11), %s2058_s3, 1024, %s233_s11, [#allocation9], %s2033_s17, %s2033_s17, %s2035_s18  }
  0x2d   : > { %s2060_s22 = scalar_select %p1794_p7, 1, 0 }
  0x2e   : > { %p1803_p9 = pnand %p1379_p3, %p43_p5  ;;  %s1134_s15 = sshll.u32 %s1799_s23, 2 }
  0x2f   : > { %s1135_s14 = sshll.u32 %s1661_s27, 6  ;;  %s290_s16 = scalar_lea.vmem [#allocation5], %s1134_s15 }
  0x30   : > { %s297_s19 = sshll.u32 %s290_s16, 4  ;;  %s2062_s1 = sld [smem:[#allocation20_spill]]  ;;  %s298_s19 = int_to_ptr.vmem [resolvable:$true] %s297_s19 }
  0x31   : > { %s1812_s3 = scalar_lea.sflag [#allocation6], %s286_s29  ;;  %p1816_p10 = pneg %p1803_p9 }
  0x36   : > { %s295_s18 = scalar_lea.hbm %s2062_s1, %s1135_s14  ;;  %s1484_s26 = scalar_lea.hbm %s2062_s1, 128 }
  0x37   : > { %s1479_s21 = scalar_lea.hbm %s295_s18, 64  ;;  %p1485_p3 = scmp.lt.s32.totalorder %s295_s18, %s2062_s1 }
  0x38   : > { %p1480_p2 = scmp.ne.s32.totalorder %s295_s18, %s1479_s21  ;;  %p1486_p5 = scmp.lt.s32.totalorder %s1484_s26, %s1479_s21 }
  0x3a   : > { %p1482_p13 = pnand %p1816_p10, %p1480_p2  ;;  %p1487_p1 = por %p1486_p5, %p1485_p3 }
  0x3c   : > { %p1483_p0 = pneg %p1482_p13 }
  0x3e   : > { %p1488_p12 = pnand %p1487_p1, %p1483_p0 }
  0x40   : > { %1491 = shalt.err (!%p1488_p12)
}
  0x41   : > { %s1492_s29 = scalar_lea.vmem %s298_s19, 64  ;;  %s1666_s20 = smov [#allocation5]  }
  0x42   : > { %p1493_p6 = scmp.ne.s32.totalorder %s298_s19, %s1492_s29  ;;  %s1497_s13 = sshll.u32 %s1666_s20, 4  ;;  %s1498_s13 = int_to_ptr.vmem [resolvable:$false] %s1497_s13 }
  0x43   : > { %s1499_s8 = scalar_lea.vmem %s1498_s13, 128  ;;  %p1500_p2 = scmp.lt.s32.totalorder %s298_s19, %s1498_s13 }
  0x44   : > { %p1495_p7 = pnand %p1493_p6, %p1816_p10  ;;  %p1501_p13 = scmp.lt.s32.totalorder %s1499_s8, %s1492_s29 }
  0x46   : > { %p1496_p4 = pneg %p1495_p7  ;;  %p1502_p8 = por %p1501_p13, %p1500_p2 }
  0x48   : > { %p1503_p11 = pnand %p1502_p8, %p1496_p4 }
  0x4a   : > { %1506 = shalt.err (!%p1503_p11)
}
  0x4b   : > { %1369 = dma.hbm_to_vmem [thread:$0]  (!%p1803_p9), %s295_s18, 64, %s298_s19, %s1812_s3  }
  0x4c   : > { %s2064_s26 = sshll.u32 %s1799_s23, 6  ;;  %s1667_s16 = smov [#allocation10]  }
  0x4d   : > { %s308_s21 = scalar_lea.vmem [#allocation7], %s2064_s26  ;;  %s248_s17 = sshll.u32 %s1667_s16, 4  ;;  %s249_s17 = int_to_ptr.vmem [resolvable:$true] %s248_s17 }
  0x4e   : > { %s315_s15 = sshll.u32 %s308_s21, 4  ;;  %s1518_s14 = scalar_lea.vmem %s249_s17, 1024  ;;  %s1835_s15 = int_to_ptr.vmem [resolvable:$true] %s315_s15 }
  0x4f   : > { %p1519_p1 = scmp.ne.s32.totalorder %s249_s17, %s1518_s14  ;;  %p2065_p6 = scmp.ne.s32.totalorder %s2056_s12, 0 }
  0x50   : > { %p1526_p11 = scmp.lt.s32.totalorder %s249_s17, %s249_s17  ;;  %p1527_p7 = scmp.lt.s32.totalorder %s1518_s14, %s1518_s14 }
  0x51   : > { %p2066_p12 = pneg %p2065_p6 }
  0x52   : > { %p1528_p0 = por %p1527_p7, %p1526_p11 }
  0x53   : > { %p1521_p4 = pnand %p1519_p1, %p2066_p12 }
  0x55   : > { %p1522_p8 = pneg %p1521_p4 }
  0x57   : > { %p1529_p3 = pnand %p1528_p0, %p1522_p8 }
  0x59   : > { %1532 = shalt.err (!%p1529_p3)
}
  0x5a   : > { %s2067_s8 = smov 4   ;;  %s2068_s13 = smov 64  }
  0x5b   : > { %s2069_s5 = sld [smem:[#allocation22_spill]]  ;;  %s1184_s29 = sshll.u32 %s1661_s27, 10 }
  0x5c   : > { %s2070_s20 = smov %s2064_s26  ;;  %s1856_s12 = scalar_lea.hbm %s2025_s0, %s1184_s29 }
  0x5d   : > { %s269_s26 = scalar_lea.vmem [#allocation2], %s2070_s20  ;;  %s266_s18 = scalar_lea.sflag [#allocation3], %s1799_s23 }
  0x5e   : > { %s276_s21 = sshll.u32 %s269_s26, 4  ;;  %s1533_s19 = scalar_lea.hbm %s1856_s12, 1024  ;;  %s1858_s21 = int_to_ptr.vmem [resolvable:$true] %s276_s21 }
  0x5f   : > { %p1534_p5 = scmp.ne.s32.totalorder %s1856_s12, %s1533_s19  ;;  %s1538_s26 = scalar_lea.hbm %s2025_s0, 2048 }
  0x60   : > { %p1539_p1 = scmp.lt.s32.totalorder %s1856_s12, %s2025_s0 }
  0x61   : > { %1362 = dma.hbm_to_vmem [thread:$0]  (!%p2065_p6), %s2069_s5, 1024, %s249_s17, [#allocation9], %s2068_s13, %s2068_s13, %s2067_s8  }
  0x62   : > { %p1536_p2 = pnand %p1534_p5, %p1816_p10  ;;  %p1540_p6 = scmp.lt.s32.totalorder %s1538_s26, %s1533_s19 }
  0x64   : > { %p1537_p13 = pneg %p1536_p2  ;;  %p1541_p12 = por %p1540_p6, %p1539_p1 }
  0x66   : > { %p1542_p4 = pnand %p1541_p12, %p1537_p13 }
  0x68   : > { %1545 = shalt.err (!%p1542_p4)
}
  0x69   : > { %s1546_s23 = scalar_lea.vmem %s1858_s21, 1024  ;;  %s1668_s16 = smov [#allocation2]  }
  0x6a   : > { %p1547_p8 = scmp.ne.s32.totalorder %s1858_s21, %s1546_s23  ;;  %s1551_s14 = sshll.u32 %s1668_s16, 4  ;;  %s1552_s14 = int_to_ptr.vmem [resolvable:$false] %s1551_s14 }
  0x6b   : > { %s1553_s17 = scalar_lea.vmem %s1552_s14, 2048  ;;  %p1554_p0 = scmp.lt.s32.totalorder %s1858_s21, %s1552_s14 }
  0x6c   : > { %p1549_p11 = pnand %p1547_p8, %p1816_p10  ;;  %p1555_p3 = scmp.lt.s32.totalorder %s1553_s17, %s1546_s23 }
  0x6e   : > { %p1550_p7 = pneg %p1549_p11  ;;  %p1556_p5 = por %p1555_p3, %p1554_p0 }
  0x70   : > { %p1557_p2 = pnand %p1556_p5, %p1550_p7 }
  0x72   : > { %1560 = shalt.err (!%p1557_p2)
}
  0x73   : > { %1366 = dma.hbm_to_vmem [thread:$0]  (!%p1803_p9), %s1856_s12, 1024, %s1858_s21, %s266_s18, %s2068_s13, %s2068_s13, %s2067_s8  }
  0x74   : > { %s314_s19 = scalar_lea.hbm %s2027_s2, %s1184_s29  ;;  %s1566_s16 = scalar_lea.hbm %s2027_s2, 2048 }
  0x75   : > { %s1561_s20 = scalar_lea.hbm %s314_s19, 1024  ;;  %p1567_p12 = scmp.lt.s32.totalorder %s314_s19, %s2027_s2 }
  0x76   : > { %p1562_p13 = scmp.ne.s32.totalorder %s314_s19, %s1561_s20  ;;  %p1568_p4 = scmp.lt.s32.totalorder %s1566_s16, %s1561_s20 }
  0x78   : > { %p1564_p1 = pnand %p1562_p13, %p1816_p10  ;;  %p1569_p8 = por %p1568_p4, %p1567_p12 }
  0x7a   : > { %p1565_p6 = pneg %p1564_p1 }
  0x7c   : > { %p1570_p11 = pnand %p1569_p8, %p1565_p6 }
  0x7e   : > { %1573 = shalt.err (!%p1570_p11)
}
  0x7f   : > { %s1574_s29 = scalar_lea.vmem %s1835_s15, 1024  ;;  %s1669_s21 = smov [#allocation7]  }
  0x80   : > { %p1575_p7 = scmp.ne.s32.totalorder %s1835_s15, %s1574_s29  ;;  %s1579_s12 = sshll.u32 %s1669_s21, 4  ;;  %s1580_s12 = int_to_ptr.vmem [resolvable:$false] %s1579_s12 }
  0x81   : > { %s1581_s18 = scalar_lea.vmem %s1580_s12, 2048  ;;  %p1582_p5 = scmp.lt.s32.totalorder %s1835_s15, %s1580_s12 }
  0x82   : > { %p1577_p0 = pnand %p1575_p7, %p1816_p10  ;;  %p1583_p2 = scmp.lt.s32.totalorder %s1581_s18, %s1574_s29 }
  0x84   : > { %p1578_p3 = pneg %p1577_p0  ;;  %p1584_p13 = por %p1583_p2, %p1582_p5 }
  0x86   : > { %p1585_p1 = pnand %p1584_p13, %p1578_p3 }
  0x88   : > { %1588 = shalt.err (!%p1585_p1)
}
  0x89   : > { %1372 = dma.hbm_to_vmem [thread:$0]  (!%p1803_p9), %s314_s19, 1024, %s1835_s15, %s1812_s3, %s2068_s13, %s2068_s13, %s2067_s8  }
  0x8a   : > { %p2071_p10 = scmp.ne.s32.totalorder %s2055_s9, 0 }
  0x8b   : > { %s1912_s10 = sand.u32 (!%p2071_p10), 1, %s1653_s25   ;;  %p2072_p6 = scmp.ne.s32.totalorder (!%p2071_p10), %s2052_s30, 0 }
  0x8c   : > { %327 = sbr.rel (%p2071_p10) target bundleno = 1102 (0x44e), region = 48  ;;  %s1140_s1 = sshll.u32 (!%p2071_p10), %s1912_s10, 6 }
  0x8d   : > { %s330_s5 = scalar_lea.sflag (!%p2071_p10), [#allocation3], %s1912_s10  ;;  %s1916_s20 = scalar_lea.vmem (!%p2071_p10), [#allocation2], %s1140_s1 }
  0x91   : > { %1632 = dma.done.wait (%p2072_p6), %s330_s5, 1024  }
  0x92   : > { %1634 = vsyncadd (%p2072_p6), %s330_s5, 4294966272  ;;  %s338_s3 = sand.u32 1, %s1734_s28   ;;  %s1141_s9 = sshll.u32 %s1912_s10, 2 }
  0x93   : > { %s339_s11 = scalar_lea.sflag [#allocation6], %s338_s3  ;;  %s1924_s15 = scalar_lea.vmem [#allocation5], %s1141_s9 }
  0x94   : > { %1636 = dma.done.wait (%p2072_p6), %s339_s11, 1088  }
  0x95   : > { %1638 = vsyncadd (%p2072_p6), %s339_s11, 4294966208  ;;  %s1930_s8 = scalar_lea.vmem [#allocation7], %s1140_s1  ;;  %p2073_p9 = scmp.eq.s32.totalorder %s1734_s28, 0 }
  0x97   : > { %1640 = dma.done.wait (%p2073_p9), [#allocation9], 2048   ;;  %p2074_p12 = pmov %p2073_p9 }
  0x98   : > { %v1421_v0 = vld [vmem:[#allocation8 + $0x38] sm:$0xff]   ;;  %v1422_v1 = vld [vmem:[#allocation8 + $0x30] sm:$0xff]   ;;  %v1423_v2 = vld [vmem:[#allocation8 + $0x28] sm:$0xff]   ;;  %v1670_v48 = vmov 0.0   ;;  %vm1671_vm0 = vmmov 0   ;;  %s1145_s19 = sshll.u32 %s1912_s10, 3 }
  0x99   : > { %1642 = vsyncadd (%p2074_p12), [#allocation9], 4294965248  ;;  %1236 = vmatprep.subr.bf16.mxu0 %v1421_v0  ;;  %v1424_v3 = vld [vmem:[#allocation8 + $0x20] sm:$0xff]   ;;  %v1425_v5 = vld [vmem:[#allocation8 + $0x18] sm:$0xff]   ;;  %s1181_s16 = sshll.u32 %s1734_s28, 7  ;;  %s399_s14 = scalar_lea.vmem [#allocation11], %s1145_s19 }
  0x9a   : > { %1237 = vmatpush3.bf16.msra.mxu0 %v1421_v0  ;;  %v1429_v4 = vld [vmem:[%s1930_s8] sm:$0xff]   ;;  %v1426_v6 = vld [vmem:[#allocation8 + $0x10] sm:$0xff]   ;;  %v1427_v7 = vld [vmem:[#allocation8 + $0x8] sm:$0xff]   ;;  %s994_s17 = sshll.u32 %s399_s14, 4  ;;  %s1982_s12 = scalar_lea.hbm %s2032_s7, %s1181_s16  ;;  %s1984_s17 = int_to_ptr.vmem [resolvable:$true] %s994_s17 }
  0x9b   : > { %1238 = vmatprep.subr.bf16.mxu0 %v1422_v1  ;;  %1252 = vmatprep.mubr.bf16.mxu0 %v1429_v4  ;;  %v1428_v8 = vld [vmem:[#allocation8] sm:$0xff]   ;;  %v1430_v9 = vld [vmem:[%s1930_s8 + $0x8] sm:$0xff]   ;;  %v1431_v10 = vld [vmem:[%s1930_s8 + $0x10] sm:$0xff]   ;;  %s981_s18 = scalar_lea.sflag [#allocation4], %s1912_s10  ;;  %s1589_s1 = scalar_lea.vmem %s1984_s17, 128 }
  0x9c   : > { %v1432_v11 = vld [vmem:[%s1930_s8 + $0x18] sm:$0xff]   ;;  %v1433_v12 = vld [vmem:[%s1930_s8 + $0x20] sm:$0xff]   ;;  %v1434_v13 = vld [vmem:[%s1930_s8 + $0x28] sm:$0xff]   ;;  %p1590_p4 = scmp.ne.s32.totalorder %s1984_s17, %s1589_s1  ;;  %p2075_p8 = scmp.ne.s32.totalorder %s2060_s22, 0 }
  0x9d   : > { %v1435_v14 = vld [vmem:[%s1930_s8 + $0x30] sm:$0xff]   ;;  %v1436_v15 = vld [vmem:[%s1930_s8 + $0x38] sm:$0xff]   ;;  %v1438_v41 = vld [vmem:[%s1916_s20 + $0x8] sm:$0xff]   ;;  %s1672_s28 = smov [#allocation11]  }
  0x9e   : > { %1239 = vmatpush3.bf16.msra.mxu0 %v1422_v1  ;;  %v1437_v16 = vld [vmem:[%s1916_s20] sm:$0xff]   ;;  %v1439_v42 = vld [vmem:[%s1916_s20 + $0x10] sm:$0xff]   ;;  %v1440_v43 = vld [vmem:[%s1916_s20 + $0x18] sm:$0xff]   ;;  %p1591_p11 = pnand %p1590_p4, %p2075_p8  ;;  %s1593_s5 = sshll.u32 %s1672_s28, 4  ;;  %s1594_s5 = int_to_ptr.vmem [resolvable:$false] %s1593_s5 }
  0x9f   : > { %1240 = vmatprep.subr.bf16.mxu0 %v1423_v2  ;;  %1284 = vmatprep.mubr.bf16.mxu1 %v1437_v16  ;;  %v1441_v44 = vld [vmem:[%s1916_s20 + $0x20] sm:$0xff]   ;;  %v1442_v45 = vld [vmem:[%s1916_s20 + $0x28] sm:$0xff]   ;;  %v1443_v46 = vld [vmem:[%s1916_s20 + $0x30] sm:$0xff]   ;;  %p1596_p0 = scmp.lt.s32.totalorder %s1984_s17, %s1594_s5 }
  0xa0   : > { %v1444_v47 = vld [vmem:[%s1916_s20 + $0x38] sm:$0xff]   ;;  %v1445_v49 = vld [vmem:[#allocation10 + $0x38] sm:$0xff]   ;;  %v1447_v51 = vld [vmem:[#allocation10 + $0x28] sm:$0xff]   ;;  %p1592_p7 = pneg %p1591_p11  ;;  %s1595_s20 = scalar_lea.vmem %s1594_s5, 256 }
  0xa1   : > { %v1446_v50 = vld [vmem:[#allocation10 + $0x30] sm:$0xff]   ;;  %v1448_v52 = vld [vmem:[#allocation10 + $0x20] sm:$0xff]   ;;  %v1449_v53 = vld [vmem:[#allocation10 + $0x18] sm:$0xff]   ;;  %p1597_p3 = scmp.lt.s32.totalorder %s1595_s20, %s1589_s1 }
  0xa2   : > { %1241 = vmatpush3.bf16.msra.mxu0 %v1423_v2  ;;  %v1450_v54 = vld [vmem:[#allocation10 + $0x10] sm:$0xff]   ;;  %v1451_v55 = vld [vmem:[#allocation10 + $0x8] sm:$0xff]  }
  0xa3   : > { %1242 = vmatprep.subr.bf16.mxu0 %v1424_v3  ;;  %p1598_p5 = por %p1597_p3, %p1596_p0 }
  0xa5   : > { %p1599_p2 = pnand %p1598_p5, %p1592_p7 }
  0xa6   : > { %1243 = vmatpush3.bf16.msra.mxu0 %v1424_v3 }
  0xa7   : > { %1244 = vmatprep.subr.bf16.mxu0 %v1425_v5 }
  0xaa   : > { %1245 = vmatpush3.bf16.msra.mxu0 %v1425_v5  ;;  %v1162_v5 = vld [vmem:[%s2029_s4] ss:$0 sm:$0xff] }
  0xab   : > { %1246 = vmatprep.subr.bf16.mxu0 %v1426_v6 }
  0xae   : > { %1247 = vmatpush3.bf16.msra.mxu0 %v1426_v6 }
  0xaf   : > { %1248 = vmatprep.subr.bf16.mxu0 %v1427_v7 }
  0xb2   : > { %1249 = vmatpush3.bf16.msra.mxu0 %v1427_v7 }
  0xb3   : > { %1250 = vmatprep.subr.bf16.mxu0 %v1428_v8 }
  0xb6   : > { %1251 = vmatpush3.bf16.msra.mxu0 %v1428_v8 }
  0xb7   : > { %1300 = vmatprep.subr.bf16.mxu0 %v1670_v48 }
  0xb9   : > { %1253 = vmatmul.mubr.bf16.vlgmr.msra.gmra.mxu0 %v1430_v9 }
  0xba   : > { %1256 = vmatprep.mubr.bf16.mxu0 %v1431_v10 }
  0xc1   : > { %1257 = vmatmul.mubr.bf16.gmra.mxu0 %v1432_v11 }
  0xc2   : > { %1260 = vmatprep.mubr.bf16.mxu0 %v1433_v12 }
  0xc9   : > { %1261 = vmatmul.mubr.bf16.gmra.mxu0 %v1434_v13 }
  0xca   : > { %1264 = vmatprep.mubr.bf16.mxu0 %v1435_v14 }
  0xd1   : > { %1265 = vmatmul.mubr.bf16.gmra.mxu0 %v1436_v15 }
  0xd2   : > { %1316 = vmatprep.mubr.msk.bf16.mxu0 %vm1671_vm0, %v1670_v48 }
 0x179   : > { %v1254_v17 = vpop.f32.mrf.mxu0 }
 0x17b   : > { %v580_v18 = vpop.f32.mrf.mxu0 }
 0x17d   : > { %v1255_v19 = vpop.f32.mrf.mxu0 }
 0x17e   : > { %v644_v39 = vpack.c.bf16 %v1255_v19, %v1254_v17 }
 0x17f   : > { %v583_v20 = vpop.f32.mrf.mxu0 }
 0x180   : > { %v643_v40 = vpack.c.bf16 %v583_v20, %v580_v18 }
 0x181   : > { %v1258_v21 = vpop.f32.mrf.mxu0 }
 0x183   : > { %v596_v22 = vpop.f32.mrf.mxu0 }
 0x185   : > { %v1259_v23 = vpop.f32.mrf.mxu0 }
 0x186   : > { %v646_v37 = vpack.c.bf16 %v1259_v23, %v1258_v21 }
 0x187   : > { %v599_v24 = vpop.f32.mrf.mxu0 }
 0x188   : > { %v645_v38 = vpack.c.bf16 %v599_v24, %v596_v22 }
 0x189   : > { %v1262_v25 = vpop.f32.mrf.mxu0 }
 0x18b   : > { %v612_v26 = vpop.f32.mrf.mxu0 }
 0x18d   : > { %v1263_v27 = vpop.f32.mrf.mxu0 }
 0x18e   : > { %v648_v35 = vpack.c.bf16 %v1263_v27, %v1262_v25 }
 0x18f   : > { %v615_v28 = vpop.f32.mrf.mxu0 }
 0x190   : > { %v647_v36 = vpack.c.bf16 %v615_v28, %v612_v26 }
 0x191   : > { %v1266_v29 = vpop.f32.mrf.mxu0 }
 0x193   : > { %v628_v30 = vpop.f32.mrf.mxu0 }
 0x195   : > { %v1267_v31 = vpop.f32.mrf.mxu0 }
 0x196   : > { %v650_v32 = vpack.c.bf16 %v1267_v31, %v1266_v29 }
 0x197   : > { %v631_v33 = vpop.f32.mrf.mxu0 }
 0x198   : > { %v649_v34 = vpack.c.bf16 %v631_v33, %v628_v30  ;;  %1268 = vmatprep.subr.bf16.mxu1 %v650_v32 }
 0x199   : > { %1269 = vmatpush3.bf16.msra.mxu1 %v650_v32 }
 0x19a   : > { %1270 = vmatprep.subr.bf16.mxu1 %v649_v34 }
 0x19d   : > { %1271 = vmatpush3.bf16.msra.mxu1 %v649_v34 }
 0x19e   : > { %1272 = vmatprep.subr.bf16.mxu1 %v648_v35 }
 0x1a1   : > { %1273 = vmatpush3.bf16.msra.mxu1 %v648_v35 }
 0x1a2   : > { %1274 = vmatprep.subr.bf16.mxu1 %v647_v36 }
 0x1a5   : > { %1275 = vmatpush3.bf16.msra.mxu1 %v647_v36 }
 0x1a6   : > { %1276 = vmatprep.subr.bf16.mxu1 %v646_v37 }
 0x1a9   : > { %1277 = vmatpush3.bf16.msra.mxu1 %v646_v37 }
 0x1aa   : > { %1278 = vmatprep.subr.bf16.mxu1 %v645_v38 }
 0x1ad   : > { %1279 = vmatpush3.bf16.msra.mxu1 %v645_v38 }
 0x1ae   : > { %1280 = vmatprep.subr.bf16.mxu1 %v644_v39 }
 0x1b1   : > { %1281 = vmatpush3.bf16.msra.mxu1 %v644_v39 }
 0x1b2   : > { %1282 = vmatprep.subr.bf16.mxu1 %v643_v40 }
 0x1b5   : > { %1283 = vmatpush3.bf16.msra.mxu1 %v643_v40 }
 0x1b6   : > { %1320 = vmatprep.subr.bf16.mxu1 %v1670_v48 }
 0x1b8   : > { %1285 = vmatmul.mubr.bf16.vlgmr.msra.gmra.mxu1 %v1438_v41 }
 0x1b9   : > { %1288 = vmatprep.mubr.bf16.mxu1 %v1439_v42  ;;  %1321 = vmatpush3.bf16.msra.mxu1 %v1445_v49 }
 0x1ba   : > { %1322 = vmatprep.subr.bf16.mxu1 %v1670_v48 }
 0x1bd   : > { %1323 = vmatpush3.bf16.msra.mxu1 %v1446_v50  ;;  %v417_v50 = vld [vmem:[%s1924_s15] sm:$0xf] }
 0x1be   : > { %1324 = vmatprep.subr.bf16.mxu1 %v1670_v48 }
 0x1c0   : > { %1289 = vmatmul.mubr.bf16.gmra.mxu1 %v1440_v43 }
 0x1c1   : > { %1292 = vmatprep.mubr.bf16.mxu1 %v1441_v44  ;;  %1325 = vmatpush3.bf16.msra.mxu1 %v1447_v51  ;;  %v1452_v51 = vld [vmem:[#allocation10] sm:$0xff]  }
 0x1c2   : > { %1326 = vmatprep.subr.bf16.mxu1 %v1670_v48 }
 0x1c5   : > { %1327 = vmatpush3.bf16.msra.mxu1 %v1448_v52 }
 0x1c6   : > { %1328 = vmatprep.subr.bf16.mxu1 %v1670_v48 }
 0x1c8   : > { %1293 = vmatmul.mubr.bf16.gmra.mxu1 %v1442_v45 }
 0x1c9   : > { %1296 = vmatprep.mubr.bf16.mxu1 %v1443_v46  ;;  %1329 = vmatpush3.bf16.msra.mxu1 %v1449_v53 }
 0x1ca   : > { %1330 = vmatprep.subr.bf16.mxu1 %v1670_v48 }
 0x1cd   : > { %1331 = vmatpush3.bf16.msra.mxu1 %v1450_v54 }
 0x1ce   : > { %1332 = vmatprep.subr.bf16.mxu1 %v1670_v48 }
 0x1d0   : > { %1297 = vmatmul.mubr.bf16.gmra.mxu1 %v1444_v47 }
 0x1d1   : > { %1336 = vmatprep.mubr.msk.bf16.mxu1 %vm1671_vm0, %v1670_v48  ;;  %1333 = vmatpush3.bf16.msra.mxu1 %v1451_v55 }
 0x1d2   : > { %1334 = vmatprep.subr.bf16.mxu1 %v1670_v48 }
 0x1d5   : > { %1335 = vmatpush3.bf16.msra.mxu1 %v1452_v51 }
 0x278   : > { %v1286_v56 = vpop.f32.mrf.mxu1 }
 0x279   : > { %v749_v38 = vadd.f32 %v1286_v56, %v1162_v5 }
 0x27a   : > { %v740_v57 = vpop.f32.mrf.mxu1 }
 0x27b   : > { %v805_v43 = vmax.f32 %v749_v38, 0.0  ;;  %v741_v44 = vadd.f32 %v1162_v5, %v740_v57  ;;  %v1171_v57 = vld [vmem:[%s2031_s6] ss:$0 sm:$0xff] }
 0x27c   : > { %v1287_v58 = vpop.f32.mrf.mxu1 }
 0x27d   : > { %v752_v35 = vadd.f32 %v1287_v58, %v1162_v5  ;;  %v803_v47 = vmax.f32 %v741_v44, 0.0 }
 0x27e   : > { %v743_v59 = vpop.f32.mrf.mxu1 }
 0x27f   : > { %v806_v40 = vmax.f32 %v752_v35, 0.0  ;;  %v744_v41 = vadd.f32 %v1162_v5, %v743_v59 }
 0x280   : > { %v1290_v60 = vpop.f32.mrf.mxu1 }
 0x281   : > { %v765_v28 = vadd.f32 %v1290_v60, %v1162_v5  ;;  %v820_v45 = vpack.c.bf16 %v806_v40, %v805_v43  ;;  %v804_v46 = vmax.f32 %v744_v41, 0.0 }
 0x282   : > { %v756_v61 = vpop.f32.mrf.mxu1 }
 0x283   : > { %v809_v33 = vmax.f32 %v765_v28, 0.0  ;;  %v757_v34 = vadd.f32 %v1162_v5, %v756_v61  ;;  %v819_v49 = vpack.c.bf16 %v804_v46, %v803_v47 }
 0x284   : > { %v1291_v62 = vpop.f32.mrf.mxu1 }
 0x285   : > { %v768_v25 = vadd.f32 %v1291_v62, %v1162_v5  ;;  %v807_v39 = vmax.f32 %v757_v34, 0.0 }
 0x286   : > { %v759_v63 = vpop.f32.mrf.mxu1 }
 0x287   : > { %v810_v30 = vmax.f32 %v768_v25, 0.0  ;;  %v760_v31 = vadd.f32 %v1162_v5, %v759_v63 }
 0x288   : > { %v1294_v0 = vpop.f32.mrf.mxu1 }
 0x289   : > { %v781_v18 = vadd.f32 %v1294_v0, %v1162_v5  ;;  %v822_v36 = vpack.c.bf16 %v810_v30, %v809_v33  ;;  %v808_v37 = vmax.f32 %v760_v31, 0.0 }
 0x28a   : > { %v772_v1 = vpop.f32.mrf.mxu1 }
 0x28b   : > { %v813_v23 = vmax.f32 %v781_v18, 0.0  ;;  %v773_v24 = vadd.f32 %v1162_v5, %v772_v1  ;;  %v821_v42 = vpack.c.bf16 %v808_v37, %v807_v39 }
 0x28c   : > { %v1295_v2 = vpop.f32.mrf.mxu1 }
 0x28d   : > { %v784_v15 = vadd.f32 %v1295_v2, %v1162_v5  ;;  %v811_v29 = vmax.f32 %v773_v24, 0.0 }
 0x28e   : > { %v775_v3 = vpop.f32.mrf.mxu1 }
 0x28f   : > { %v814_v20 = vmax.f32 %v784_v15, 0.0  ;;  %v776_v21 = vadd.f32 %v1162_v5, %v775_v3 }
 0x290   : > { %v1298_v4 = vpop.f32.mrf.mxu1 }
 0x291   : > { %v797_v7 = vadd.f32 %v1298_v4, %v1162_v5  ;;  %v824_v26 = vpack.c.bf16 %v814_v20, %v813_v23  ;;  %v812_v27 = vmax.f32 %v776_v21, 0.0 }
 0x292   : > { %v788_v6 = vpop.f32.mrf.mxu1 }
 0x293   : > { %v817_v11 = vmax.f32 %v797_v7, 0.0  ;;  %v789_v12 = vadd.f32 %v1162_v5, %v788_v6  ;;  %v823_v32 = vpack.c.bf16 %v812_v27, %v811_v29 }
 0x294   : > { %v1299_v8 = vpop.f32.mrf.mxu1 }
 0x295   : > { %v800_v9 = vadd.f32 %v1299_v8, %v1162_v5  ;;  %v815_v19 = vmax.f32 %v789_v12, 0.0 }
 0x296   : > { %v791_v10 = vpop.f32.mrf.mxu1 }
 0x297   : > { %v818_v13 = vmax.f32 %v800_v9, 0.0  ;;  %v792_v14 = vadd.f32 %v1162_v5, %v791_v10 }
 0x299   : > { %v826_v16 = vpack.c.bf16 %v818_v13, %v817_v11  ;;  %v816_v17 = vmax.f32 %v792_v14, 0.0 }
 0x29b   : > { %1301 = vmatpush3.bf16.msra.mxu0 %v826_v16  ;;  %v825_v22 = vpack.c.bf16 %v816_v17, %v815_v19 }
 0x29c   : > { %1302 = vmatprep.subr.bf16.mxu0 %v1670_v48 }
 0x29f   : > { %1303 = vmatpush3.bf16.msra.mxu0 %v825_v22 }
 0x2a0   : > { %1304 = vmatprep.subr.bf16.mxu0 %v1670_v48 }
 0x2a3   : > { %1305 = vmatpush3.bf16.msra.mxu0 %v824_v26 }
 0x2a4   : > { %1306 = vmatprep.subr.bf16.mxu0 %v1670_v48 }
 0x2a7   : > { %1307 = vmatpush3.bf16.msra.mxu0 %v823_v32 }
 0x2a8   : > { %1308 = vmatprep.subr.bf16.mxu0 %v1670_v48 }
 0x2ab   : > { %1309 = vmatpush3.bf16.msra.mxu0 %v822_v36 }
 0x2ac   : > { %1310 = vmatprep.subr.bf16.mxu0 %v1670_v48 }
 0x2af   : > { %1311 = vmatpush3.bf16.msra.mxu0 %v821_v42 }
 0x2b0   : > { %1312 = vmatprep.subr.bf16.mxu0 %v1670_v48 }
 0x2b3   : > { %1313 = vmatpush3.bf16.msra.mxu0 %v820_v45 }
 0x2b4   : > { %1314 = vmatprep.subr.bf16.mxu0 %v1670_v48 }
 0x2b7   : > { %1315 = vmatpush3.bf16.msra.mxu0 %v819_v49 }
 0x2ba   : > { %1317 = vmatmul.mubr.bf16.vlgmr.msra.gmra.mxu0 %v417_v50 }
 0x37a   : > { %v861_v52 = vpop.f32.mrf.mxu0 }
 0x37b   : > { %v867_v53 = vpack.c.bf16 %v861_v52, %v861_v52 }
 0x37c   : > { %v1318_v54 = vpop.f32.mrf.mxu0 }
 0x37d   : > { %1337 = vmatmul.mubr.bf16.vlgmr.msra.gmra.mxu1 %v867_v53 }
 0x37e   : > { %v864_v55 = vpop.f32.mrf.mxu0 }
 0x380   : > { %v1319_v56 = vpop.f32.mrf.mxu0 }
 0x43d   : > { %v973_v48 = vpop.f32.mrf.mxu1 }
 0x43e   : > { %v974_v58 = vadd.f32 %v1171_v57, %v973_v48 }
 0x43f   : > { %v1338_v59 = vpop.f32.mrf.mxu1 }
 0x440   : > { %979 = vst [vmem:[%s399_s14] sm:$0xff] %v974_v58 }
 0x441   : > { %v976_v60 = vpop.f32.mrf.mxu1 }
 0x442   : > { %1602 = shalt.err (!%p1599_p2)
}
 0x443   : > { %s1603_s3 = scalar_lea.hbm %s1982_s12, 128  ;;  %s1607_s11 = scalar_lea.hbm %s2032_s7, 256 }
 0x444   : > { %p1604_p13 = scmp.ne.s32.totalorder %s1982_s12, %s1603_s3  ;;  %p1608_p6 = scmp.lt.s32.totalorder %s1982_s12, %s2032_s7 }
 0x445   : > { %p1609_p9 = scmp.lt.s32.totalorder %s1607_s11, %s1603_s3 }
 0x446   : > { %p1605_p1 = pnand %p1604_p13, %p2075_p8 }
 0x447   : > { %p1610_p12 = por %p1609_p9, %p1608_p6 }
 0x448   : > { %p1606_p10 = pneg %p1605_p1 }
 0x44a   : > { %p1611_p4 = pnand %p1610_p12, %p1606_p10 }
 0x44c   : > { %1614 = shalt.err (!%p1611_p4)
}
 0x44d   : > { %1354 = dma.vmem_to_hbm [thread:$0]  (%p2075_p8), %s1984_s17, 128, %s1982_s12, %s981_s18   ;;  %v1339_v61 = vpop.f32.mrf.mxu1 }
 0x44e PF: > { %s2076_s30 = sld [smem:[#allocation17_spill]]  ;;  %s1006_s13 = sand.u32 1, %s1649_s24  }
 0x44f   : > { %p2078_p7 = scmp.ge.s32.totalorder %s1661_s27, 2  ;;  %s1007_s19 = scalar_lea.sflag [#allocation4], %s1006_s13 }
 0x454   : > { %p2077_p11 = scmp.ne.s32.totalorder %s2076_s30, 0 }
 0x456   : > { %p1374_p0 = pnand %p2078_p7, %p2077_p11 }
 0x458   : > { %p1375_p3 = pneg %p1374_p0 }
 0x45a   : > { %1644 = dma.done.wait (%p1375_p3), %s1007_s19, 128  }
 0x45b   : > { %1646 = vsyncadd (%p1375_p3), %s1007_s19, 4294967168  ;;  %s2079_s27 = sld [smem:[#allocation18_spill]]  ;;  %s2082_s24 = smov %s1653_s25 }
 0x45c   : > { %s2080_s26 = sld [smem:[#allocation16_spill]] }
 0x45d   : > { %s2081_s22 = sld [smem:[#allocation19_spill]] }
 0x461   : > { %p24_p5 = scmp.ge.s32.totalorder %s2079_s27, 4  }
 0x462   : > { %s2083_s25 = smov %s2080_s26 }
 0x463   : > { %s2084_s26 = smov %s2081_s22  ;;  %26 = sbr.rel (!%p24_p5) target bundleno = 12 (0xc), region = 125 }
 0x468   :  { %1012 = vsyncpa [#allocation3], 1 }
 0x469   :  { %1014 = vsyncpa [#allocation3 + $0x1], 1 }
 0x46a   :  { %1015 = vsyncpa [#allocation6], 1 }
 0x46b   :  { %1017 = vsyncpa [#allocation6 + $0x1], 1 }
 0x46c   :  { %1018 = vsyncpa [#allocation9], 1 }
 0x46d   :  { %1019 = vsyncpa [#allocation4], 1 }
 0x46e   :  { %1021 = vsyncpa [#allocation4 + $0x1], 1 }

</bundles_post_ra>
